<compile_context>
chip_gen: v6e
topology: v6e:2x2x1
jax: 0.10.0
libtpu: 0.0.40
codegen_flags: <defaults>
</compile_context>

<pallas_src>
import functools
import math

import jax
import jax.numpy as jnp
from jax import lax
from jax.experimental import pallas as pl
from jax.experimental.pallas import tpu as pltpu

_LANE = 128               # TPU lane width (last-dim tiling)
_SUBLANE = 8              # TPU sublane width (second-to-last dim tiling)
_MAX_TOK = 512            # default tokens per grid step (v6e can take 1024+ via tok=)
_ONE_HOT_MAX_VOCAB = 2048  # use the MXU one-hot gather up to this vocab size


def _round_up(x: int, m: int) -> int:
    return (x + m - 1) // m * m


def _vmem_capacity_bytes() -> int:
    """Generation-aware VMEM capacity; conservative 64 MiB (v7x) fallback."""
    try:
        cap = int(getattr(pltpu.get_tpu_info(), "vmem_capacity_bytes"))
        if cap > 0:
            return cap
    except Exception:
        pass
    return 64 << 20


def _embedding_kernel(ids_ref, lut_hbm, out_ref, lut_vmem, copy_sem, *,
                      scale, use_onehot):
    """One grid step: embed TOK tokens.

    ids_ref  : VMEM (1, 1, TOK) int32    -- lane-dense token ids for this tile
    lut_hbm  : ANY  (vocab, d_model)     -- embedding table resident in HBM
    out_ref  : VMEM (TOK, d_model)       -- output tile
    lut_vmem : VMEM (vocab, d_model)     -- single-buffered, pre-scaled table
    copy_sem : DMA semaphore for the table copy
    """
    # One-time (per core-group) table load: HBM -> VMEM with sqrt(d_model)
    # folded in (no per-tile scaling afterwards).  Grid axis 0 is "parallel"
    # (may be sharded across TensorCores on v7x); axis 1 is sequential, so
    # program_id(1) == 0 is the first step every core-group executes and each
    # group initialises its own scratch.  The copy is idempotent, so any
    # execution order (including redundant re-copies on single-core chips)
    # is correct.
    @pl.when(pl.program_id(1) == 0)
    def _():
        cp = pltpu.make_async_copy(lut_hbm, lut_vmem, copy_sem)
        cp.start()
        cp.wait()
        lut_vmem[...] = (lut_vmem[...].astype(jnp.float32)
                         * jnp.float32(scale)).astype(lut_vmem.dtype)

    ids = ids_ref[0]                                  # (1, TOK) int32, lane-dense
    tok = ids.shape[1]
    vocab = lut_vmem.shape[0]

    if use_onehot:
        # Exact gather as a transposed one-hot MXU matmul:
        #   one_hot_t[v, t] = (v == ids[t])
        #   rows[t, d]      = sum_v one_hot_t[v, t] * lut[v, d]
        # Built directly from the lane-dense ids (no lane->sublane relayout);
        # contracting dim 0 of both operands is the standard transposed-LHS
        # matmul pattern.  Exact: each column selects exactly one table row.
        iota_v = lax.broadcasted_iota(jnp.int32, (vocab, tok), 0)
        one_hot_t = (iota_v == ids).astype(lut_vmem.dtype)    # bool -> table dtype
        rows = lax.dot_general(
            one_hot_t, lut_vmem[...],
            dimension_numbers=(((0,), (0,)), ((), ())),
            preferred_element_type=jnp.float32)               # (TOK, d_model)
    else:
        # Larger vocabularies (table still VMEM-resident): vectorized row
        # gather from the pre-scaled table.
        # TODO(synk): for tables that do not fit in VMEM (e.g. 50k x 768 on
        # v7x's 64 MiB) implement a manual per-row HBM DMA gather with deep
        # pipelining instead of relying on jnp.take.
        rows = jnp.take(lut_vmem[...], ids[0, :], axis=0)

    out_ref[...] = rows.astype(out_ref.dtype)


def _vmem_bytes_needed(vocab, d_model, tok, itemsize):
    """Padded VMEM footprint: single table copy + pipelined I/O + temporaries."""
    d_lane = _round_up(d_model, _LANE)
    t_lane = _round_up(tok, _LANE)
    v_sub = _round_up(vocab, _SUBLANE)
    table = v_sub * d_lane * itemsize              # single-buffered lut copy
    out_io = 2 * tok * d_lane * itemsize           # double-buffered output tiles
    ids_io = 2 * _SUBLANE * t_lane * 4             # double-buffered (1,1,TOK) i32 tiles
    onehot = v_sub * t_lane * itemsize             # per-tile one-hot intermediate
    acc = tok * d_lane * 4                         # f32 matmul result
    return table + out_io + ids_io + onehot + acc


def embeddings_forward(x_ids, lut, *, tok=None, num_core_groups=None):
    """Embeddings.forward:  lut[x] * sqrt(d_model).

    x_ids : integer ids, any shape (e.g. (B, S))
    lut   : (vocab, d_model) table (f32 or bf16; a bf16 table halves VMEM/HBM)
    """
    vocab, d_model = lut.shape
    lead_shape = tuple(int(s) for s in x_ids.shape)
    N = 1
    for s in lead_shape:
        N *= s

    use_onehot = vocab <= _ONE_HOT_MAX_VOCAB

    if tok is None:
        tok = max(_SUBLANE, min(_MAX_TOK, _round_up(N, _SUBLANE)))
    else:
        tok = max(_SUBLANE, _round_up(int(tok), _SUBLANE))

    n_tiles = -(-N // tok)
    n_pad = n_tiles * tok

    # v7x has 2 TensorCores per chip: split tiles into core groups along a
    # "parallel" grid axis.  Harmless on single-core v5e/v6e (one redundant,
    # idempotent table copy per extra group).
    if num_core_groups is None:
        num_core_groups = 2 if (n_tiles >= 8 and n_tiles % 2 == 0) else 1
    ncs = max(1, int(num_core_groups))
    if n_tiles % ncs != 0:
        ncs = 1
    tpc = n_tiles // ncs

    # Token ids: flatten, clamp (no silent OOB table reads), pad to the tile
    # grid, and lay out lane-dense as (n_tiles, 1, TOK).
    ids = jnp.clip(x_ids.reshape(-1).astype(jnp.int32), 0, vocab - 1)
    if n_pad != N:
        ids = jnp.pad(ids, (0, n_pad - N))
    ids = ids.reshape(n_tiles, 1, tok)

    itemsize = jnp.dtype(lut.dtype).itemsize
    cap = _vmem_capacity_bytes()
    need = _vmem_bytes_needed(vocab, d_model, tok, itemsize)
    if need > int(0.9 * cap):
        # TODO(synk): HBM DMA row-gather fallback for tables exceeding VMEM.
        raise NotImplementedError(
            f"embedding table needs ~{need >> 20} MiB VMEM but only "
            f"{cap >> 20} MiB is available on this TPU generation")
    vmem_limit = min(int(0.95 * cap), max(2 * need + (2 << 20), 32 << 20))

    kernel = functools.partial(_embedding_kernel,
                               scale=math.sqrt(d_model),
                               use_onehot=use_onehot)

    out = pl.pallas_call(
        kernel,
        out_shape=jax.ShapeDtypeStruct((N, d_model), lut.dtype),
        grid_spec=pltpu.PrefetchScalarGridSpec(
            num_scalar_prefetch=0,
            grid=(ncs, tpc),
            in_specs=[
                pl.BlockSpec((1, 1, tok), lambda i, j: (i * tpc + j, 0, 0)),
                pl.BlockSpec(memory_space=pl.ANY),        # table stays in HBM
            ],
            out_specs=pl.BlockSpec((tok, d_model), lambda i, j: (i * tpc + j, 0)),
            scratch_shapes=[
                pltpu.VMEM((vocab, d_model), lut.dtype),  # single table copy
                pltpu.SemaphoreType.DMA(()),
            ],
        ),
        compiler_params=pltpu.CompilerParams(
            dimension_semantics=("parallel", "arbitrary"),
            vmem_limit_bytes=vmem_limit,
        ),
    )(ids, lut)

    return out.reshape(*lead_shape, d_model)


if __name__ == "__main__":
    # --- Test 1: small shapes consistent with the module -------------------
    #   vocab = 16, d_model = 32, batch = 2, seq = 8
    d_model, vocab = 32, 16
    B, S = 2, 8

    key = jax.random.PRNGKey(0)
    k_lut, k_ids = jax.random.split(key)
    lut = jax.random.normal(k_lut, (vocab, d_model), dtype=jnp.float32)
    x = jax.random.randint(k_ids, (B, S), 0, vocab, dtype=jnp.int32)

    out = jax.block_until_ready(embeddings_forward(x, lut))
    ref = jnp.take(lut, x, axis=0) * jnp.float32(math.sqrt(d_model))
    assert out.shape == (B, S, d_model)
    assert out.dtype == lut.dtype
    assert jnp.allclose(out, ref, atol=1e-5, rtol=1e-5), float(
        jnp.max(jnp.abs(out - ref)))

    # --- Test 2: multi-tile grid, v7x core-group split, ragged last block,
    #             masked (non-multiple-of-128) d_model stores ----------------
    d_model2, vocab2 = 96, 40
    B2, S2 = 2, 79                      # 158 tokens, tok=16 -> 10 tiles, 2 groups
    k_lut2, k_ids2 = jax.random.split(jax.random.PRNGKey(1))
    lut2 = jax.random.normal(k_lut2, (vocab2, d_model2), dtype=jnp.float32)
    x2 = jax.random.randint(k_ids2, (B2, S2), 0, vocab2, dtype=jnp.int32)

    out2 = jax.block_until_ready(embeddings_forward(x2, lut2, tok=16))
    ref2 = jnp.take(lut2, x2, axis=0) * jnp.float32(math.sqrt(d_model2))
    assert out2.shape == (B2, S2, d_model2)
    assert jnp.allclose(out2, ref2, atol=1e-5, rtol=1e-5), float(
        jnp.max(jnp.abs(out2 - ref2)))

    print("KERNEL_OK")
</pallas_src>

<mosaic_0001>
module attributes {stable_mosaic.version = 11 : i64} {
  func.func @_embedding_kernel(%arg0: i32, %arg1: i32, %arg2: memref<1x1x16xi32, #tpu.memory_space<vmem>>, %arg3: memref<16x32xf32, #tpu.memory_space<any>>, %arg4: memref<16x32xf32, #tpu.memory_space<vmem>>, %arg5: memref<16x32xf32, #tpu.memory_space<vmem>>, %arg6: memref<!tpu.dma_semaphore, #tpu.memory_space<semaphore_mem>>) attributes {dimension_semantics = [#tpu.dimension_semantics<parallel>, #tpu.dimension_semantics<arbitrary>], iteration_bounds = array<i64: 1, 1>, scalar_prefetch = 0 : i64, scratch_operands = 2 : i64, tpu.core_type = #tpu.core_type<tc>, window_params = [{transform_indices = @transform_0, window_bounds = array<i64: 1, 1, 16>}, {}, {transform_indices = @transform_2, window_bounds = array<i64: 16, 32>}]} {
    %c0_i32 = arith.constant 0 : i32
    %0 = arith.cmpi eq, %arg1, %c0_i32 : i32
    %1 = arith.extui %0 : i1 to i32
    %c0_i32_0 = arith.constant 0 : i32
    %2 = arith.cmpi ne, %1, %c0_i32_0 : i32
    scf.if %2 {
      tpu.enqueue_dma source(%arg3 : memref<16x32xf32, #tpu.memory_space<any>>) target(%arg5 : memref<16x32xf32, #tpu.memory_space<vmem>>) target_semaphore(%arg6 : memref<!tpu.dma_semaphore, #tpu.memory_space<semaphore_mem>>)
      tpu.wait_dma2 semaphore(%arg6 : memref<!tpu.dma_semaphore, #tpu.memory_space<semaphore_mem>>) src(%arg3 : memref<16x32xf32, #tpu.memory_space<any>>) dst(%arg5 : memref<16x32xf32, #tpu.memory_space<vmem>>)
      %c0_7 = arith.constant 0 : index
      %c0_8 = arith.constant 0 : index
      %13 = vector.load %arg5[%c0_7, %c0_8] : memref<16x32xf32, #tpu.memory_space<vmem>>, vector<16x32xf32>
      %cst_9 = arith.constant 5.65685415 : f32
      %14 = vector.broadcast %cst_9 : f32 to vector<16x32xf32>
      %15 = arith.mulf %13, %14 : vector<16x32xf32>
      %c0_10 = arith.constant 0 : index
      %c0_11 = arith.constant 0 : index
      %16 = vector.load %arg5[%c0_10, %c0_11] : memref<16x32xf32, #tpu.memory_space<vmem>>, vector<16x32xf32>
      tpu.vector_store %arg5[%c0_10, %c0_11], %15 {strides = array<i32>} : memref<16x32xf32, #tpu.memory_space<vmem>>, vector<16x32xf32>,
    } else {
    }
    %c0 = arith.constant 0 : index
    %c0_1 = arith.constant 0 : index
    %c0_2 = arith.constant 0 : index
    %3 = vector.load %arg2[%c0, %c0_1, %c0_2] : memref<1x1x16xi32, #tpu.memory_space<vmem>>, vector<1x1x16xi32>
    %4 = vector.shape_cast %3 : vector<1x1x16xi32> to vector<1x16xi32>
    %5 = tpu.iota {dimensions = array<i32: 0>} : vector<16x16xi32>
    %6 = vector.broadcast %4 : vector<1x16xi32> to vector<16x16xi32>
    %7 = arith.cmpi eq, %5, %6 : vector<16x16xi32>
    %8 = arith.extui %7 : vector<16x16xi1> to vector<16x16xi32>
    %9 = arith.sitofp %8 : vector<16x16xi32> to vector<16x16xf32>
    %c0_3 = arith.constant 0 : index
    %c0_4 = arith.constant 0 : index
    %10 = vector.load %arg5[%c0_3, %c0_4] : memref<16x32xf32, #tpu.memory_space<vmem>>, vector<16x32xf32>
    %cst = arith.constant dense<0.000000e+00> : vector<16x32xf32>
    %11 = tpu.matmul %9, %10, %cst {dimension_numbers = #tpu.dot_dimension_numbers<[0], [0], [1], [1], [0, 1, 1, 1], [], []>} : vector<16x16xf32>, vector<16x32xf32>, vector<16x32xf32> -> vector<16x32xf32>
    %c0_5 = arith.constant 0 : index
    %c0_6 = arith.constant 0 : index
    %12 = vector.load %arg4[%c0_5, %c0_6] : memref<16x32xf32, #tpu.memory_space<vmem>>, vector<16x32xf32>
    tpu.vector_store %arg4[%c0_5, %c0_6], %11 {strides = array<i32>} : memref<16x32xf32, #tpu.memory_space<vmem>>, vector<16x32xf32>,
    return
  }
  func.func @transform_0(%arg0: i32, %arg1: i32) -> (i32, i32, i32) {
    %c1_i32 = arith.constant 1 : i32
    %0 = arith.muli %arg0, %c1_i32 : i32
    %1 = arith.addi %0, %arg1 : i32
    %c0_i32 = arith.constant 0 : i32
    %c0_i32_0 = arith.constant 0 : i32
    %c0_i32_1 = arith.constant 0 : i32
    return %1, %c0_i32, %c0_i32_0 : i32, i32, i32
  }
  func.func @transform_2(%arg0: i32, %arg1: i32) -> (i32, i32) {
    %c1_i32 = arith.constant 1 : i32
    %0 = arith.muli %arg0, %c1_i32 : i32
    %1 = arith.addi %0, %arg1 : i32
    %c0_i32 = arith.constant 0 : i32
    %c0_i32_0 = arith.constant 0 : i32
    return %1, %c0_i32 : i32, i32
  }
}

</mosaic_0001>

<bundles_post_ra>
// kernel: tpu_custom_call.1
= control target key start
LH: loop header
LB: loop body
LE: loop exit
PB: predicated region body
PF: predicated region fallthrough
CT: control target
= control target key end

     0   :  { %7 = vsyncpa [#allocation5], 0  ;;  %s336_s0 = inlined_call_operand.hbm [shape: s32[1,1,16], index: 0, kind: input, shape index: {}]   ;;  %s337_s1 = inlined_call_operand.hbm [shape: f32[16,32], index: 1, kind: input, shape index: {}]   ;;  %s338_s2 = inlined_call_operand.hbm [shape: f32[16,32], index: 2, kind: output, shape index: {}]  }
   0x1   :  { %8 = vsyncpa [#allocation6], 0  ;;  %s302_s9 = smov [#allocation4]  }
   0x2   :  { %s18_s10 = sshll.u32 %s302_s9, 4  ;;  %s19_s10 = int_to_ptr.vmem [resolvable:$true] %s18_s10 }
   0x3   :  { %s244_s11 = scalar_lea.vmem %s19_s10, 16  ;;  %s248_s12 = scalar_lea.vmem %s19_s10, 32 }
   0x4   :  { %p245_p0 = scmp.ne.s32.totalorder %s19_s10, %s244_s11  ;;  %p249_p1 = scmp.lt.s32.totalorder %s19_s10, %s19_s10 }
   0x5   :  { %p250_p2 = scmp.lt.s32.totalorder %s248_s12, %s244_s11 }
   0x7   :  { %p251_p3 = por %p250_p2, %p249_p1 }
   0x9   :  { %p252_p4 = pnand %p251_p3, %p245_p0 }
   0xb   :  { %255 = shalt.err (!%p252_p4)
}
   0xc   :  { %21 = dma.hbm_to_vmem [thread:$0]  %s336_s0, 16, %s19_s10, [#allocation5]  }
   0xd   :  { %296 = dma.done.wait [#allocation5], 16  }
   0xe   :  { %297 = vsyncadd [#allocation5], 4294967280  ;;  %s303_s15 = smov [#allocation2]  }
   0xf   :  { %s39_s16 = sshll.u32 %s303_s15, 4  ;;  %s40_s16 = int_to_ptr.vmem [resolvable:$true] %s39_s16 }
  0x10   :  { %s264_s17 = scalar_lea.vmem %s40_s16, 256  ;;  %p269_p6 = scmp.lt.s32.totalorder %s40_s16, %s40_s16 }
  0x11   :  { %p265_p5 = scmp.ne.s32.totalorder %s40_s16, %s264_s17  ;;  %p270_p7 = scmp.lt.s32.totalorder %s264_s17, %s264_s17 }
  0x13   :  { %p271_p8 = por %p270_p7, %p269_p6 }
  0x15   :  { %p272_p9 = pnand %p271_p8, %p265_p5 }
  0x17   :  { %275 = shalt.err (!%p272_p9)  }
  0x18   :  { %42 = dma.hbm_to_vmem [thread:$0]  %s337_s1, 256, %s40_s16, [#allocation3] }
  0x19   :  { %298 = dma.done.wait [#allocation3], 256 }
  0x1a   :  { %299 = vsyncadd [#allocation3], 4294967040  ;;  %v54_v0 = vlaneseq  ;;  %v46_v3 = vld [vmem:[#allocation2] sm:$0xff]  ;;  %v47_v4 = vld [vmem:[#allocation2 + $0x8] sm:$0xff]  ;;  %vm50_vm0 = vcmask 261120   ;;  %v304_v8 = vmov 0.0  }
  0x1b   :  { %v213_v5 = vld [vmem:[#allocation4] ss:$0 sm:$0xff]  ;;  %v48_v6 = vmul.f32 5.656854, %v46_v3  ;;  %v49_v7 = vmul.f32 5.656854, %v47_v4 }
  0x1c   :  { %v55_v1 = vshrl.u32 %v54_v0, 7  ;;  %vm101_vm3 = vcmask 130048   ;;  %s305_s0 = smov [#allocation7]  }
  0x1d   :  { %51 = vst.msk [vmem:[#allocation2] sm:$0xff] %vm50_vm0, %v48_v6  ;;  %52 = vst.msk [vmem:[#allocation2 + $0x8] sm:$0xff] %vm50_vm0, %v49_v7  ;;  %s195_s1 = sshll.u32 %s305_s0, 4  ;;  %s196_s1 = int_to_ptr.vmem [resolvable:$true] %s195_s1 }
  0x1e   :  { %v56_v2 = vadd.s32 8, %v55_v1  ;;  %vm61_vm1 = vcmp.eq.s32.totalorder %v55_v1, %v213_v5  ;;  %s276_s20 = scalar_lea.vmem %s196_s1, 256  ;;  %p281_p11 = scmp.lt.s32.totalorder %s196_s1, %s196_s1 }
  0x1f   :  { %v214_v9 = vsel %vm61_vm1, 1.0, %v304_v8  ;;  %p277_p10 = scmp.ne.s32.totalorder %s196_s1, %s276_s20  ;;  %p282_p12 = scmp.lt.s32.totalorder %s276_s20, %s276_s20 }
  0x20   :  { %vm62_vm2 = vcmp.eq.s32.totalorder %v56_v2, %v213_v5  ;;  %69 = vxpose.xlu0.b32.start [1/2] (short) (narrow) %v214_v9, 16 }
  0x21   :  { %v215_v10 = vsel %vm62_vm2, 1.0, %v304_v8  ;;  %p283_p13 = por %p282_p12, %p281_p11 }
  0x23   :  { %p284_p0 = pnand %p283_p13, %p277_p10 }
  0x24   :  { %70 = vxpose.xlu0.b32.end [2/2] (short) (narrow) %v215_v10, 16  ;;  %v68_v11 = vld [vmem:[#allocation2 + $0x8] sm:$0xff]  ;;  %v67_v12 = vld [vmem:[#allocation2] sm:$0xff] }
  0x25   :  { %223 = vmatprep.subr.mxu0 %v68_v11 }
  0x26   :  { %224 = vmatpush3.msra.mxu0 %v68_v11 }
  0x27   :  { %225 = vmatprep.subr.mxu0 %v67_v12 }
  0x28   :  { %226 = vmatpush3.msra.mxu0 %v67_v12 }
  0x9c   :  { %v85_v13 = vpop.trf.xlu0 }
  0x9d   :  { %227 = vmatprep.mubr.msk.f32.mxu0 %vm101_vm3, %v85_v13 }
  0xa0   :  { %v86_v14 = vpop.trf.xlu0 }
  0xa1   :  { %228 = vmatmul.mubr.msk.f32.vlgmr.msra.gmra.mxu0 %vm101_vm3, %v86_v14 }
 0x161   :  { %v229_v15 = vpop.f32.mrf.mxu0 }
 0x162   :  { %185 = vst.msk [vmem:[#allocation7 + $0x8] sm:$0xff] %vm50_vm0, %v229_v15 }
 0x163   :  { %v174_v16 = vpop.f32.mrf.mxu0 }
 0x164   :  { %184 = vst.msk [vmem:[#allocation7] sm:$0xff] %vm50_vm0, %v174_v16 }
 0x165   :  { %287 = shalt.err (!%p284_p0)
}
 0x166   :  { %s306_s21 = smov 128   ;;  %s307_s22 = smov 8  }
 0x167   :  { %201 = dma.vmem_to_hbm [thread:$0]  %s196_s1, 256, %s338_s2, [#allocation6], %s306_s21, %s306_s21, %s307_s22  }
 0x168   :  { %300 = dma.done.wait [#allocation6], 256  }
 0x169   :  { %301 = vsyncadd [#allocation6], 4294967040 }
 0x16a   :  { %205 = vsyncpa [#allocation5], 1 }
 0x16b   :  { %206 = vsyncpa [#allocation6], 1 }
 0x16c   :  { %207 = vsyncmov [#allocation3] }
 0x16f   :  { %s208_s25 = vpop.sfrf %207 }
 0x170   :  { %p218_p1 = scmp.ne.s32.totalorder %s208_s25, 0 }
 0x172   :  { %212 = shalt.err (%p218_p1)  }

</bundles_post_ra>
